<compile_context>
chip_gen: v7x
topology: tpu7x:2x2x1
jax: 0.10.0
libtpu: 0.0.40
codegen_flags: <defaults>
</compile_context>

<pallas_src>
import numpy as np
import jax
import jax.numpy as jnp
from jax.experimental import pallas as pl
from jax.experimental.pallas import tpu as pltpu  # noqa: F401  (TPU backend)

# Deterministic "parameter" from the module's __init__ (shape (1, 30)).
_PREDICTION_VALUES = np.array(
    [[0.4685, -0.2319, -0.4253, -0.1953, 0.2908, -0.2214, 0.5992, -0.2214,
      -0.2685, -0.2109, -0.5873, -0.19, 0.1967, -0.3827, 0.7656, -0.4295,
      -0.2035, -0.3758, -0.7389, -0.3573, 0.0086, 0.2333, 0.4163, 0.662,
      -0.3521, 0.6985, 0.0138, 0.6045, 0.019, 0.9076]],
    dtype=np.float32,
)
_NUM_KP = _PREDICTION_VALUES.shape[1]  # 30


def _broadcast_kernel(pred_ref, out_ref):
    # pred_ref: (1, 30) constant, loaded into VMEM once.
    # out_ref:  (N, 30) full output slab written in a single block store.
    out_ref[...] = jnp.broadcast_to(pred_ref[...], out_ref.shape)


def dummy_keypoint_model(x: jax.Array) -> jax.Array:
    """Forward pass of DummyKeypointModel.

    Args:
      x: (N, C, H, W) input (NCHW); only the batch size is used.
    Returns:
      (N, 1, 1, 30) float32 array: the constant prediction repeated per batch.
    """
    n = x.shape[0]
    pred = jnp.asarray(_PREDICTION_VALUES)  # trace-time constant

    # Single grid step: the whole (N, 30) output is one lane-dense block;
    # the constant is fetched once.  Block shapes equal the full array dims,
    # so the (8, 128) tiling constraint is satisfied.
    out_2d = pl.pallas_call(
        _broadcast_kernel,
        out_shape=jax.ShapeDtypeStruct((n, _NUM_KP), jnp.float32),
        in_specs=[pl.BlockSpec((1, _NUM_KP), lambda: (0, 0))],
        out_specs=pl.BlockSpec((n, _NUM_KP), lambda: (0, 0)),
    )(pred)

    # Layout plumbing only (no data movement beyond a metadata reshape).
    return out_2d.reshape(n, 1, 1, _NUM_KP)


if __name__ == "__main__":
    key = jax.random.PRNGKey(0)
    # Small NCHW input consistent with a keypoint-image model (grayscale).
    x = jax.random.normal(key, (2, 1, 16, 16), dtype=jnp.float32)

    out = dummy_keypoint_model(x)
    out = jax.block_until_ready(out)

    # Reference check: pure-JAX broadcast of the constant prediction.
    ref = jnp.broadcast_to(
        jnp.asarray(_PREDICTION_VALUES).reshape(1, 1, 1, _NUM_KP),
        (x.shape[0], 1, 1, _NUM_KP),
    )
    assert out.shape == (2, 1, 1, 30), out.shape
    assert out.dtype == jnp.float32, out.dtype
    assert jnp.allclose(out, ref), "mismatch vs reference broadcast"

    print("KERNEL_OK")
</pallas_src>

<mosaic_0001>
module attributes {stable_mosaic.version = 11 : i64} {
  func.func @_broadcast_kernel(%arg0: memref<1x30xf32, #tpu.memory_space<vmem>>, %arg1: memref<2x30xf32, #tpu.memory_space<vmem>>) attributes {dimension_semantics = [], scalar_prefetch = 0 : i64, scratch_operands = 0 : i64, tpu.core_type = #tpu.core_type<tc>} {
    %c0 = arith.constant 0 : index
    %c0_0 = arith.constant 0 : index
    %0 = vector.load %arg0[%c0, %c0_0] : memref<1x30xf32, #tpu.memory_space<vmem>>, vector<1x30xf32>
    %1 = vector.shape_cast %0 : vector<1x30xf32> to vector<1x30xf32>
    %2 = vector.broadcast %1 : vector<1x30xf32> to vector<2x30xf32>
    %c0_1 = arith.constant 0 : index
    %c0_2 = arith.constant 0 : index
    %3 = vector.load %arg1[%c0_1, %c0_2] : memref<2x30xf32, #tpu.memory_space<vmem>>, vector<2x30xf32>
    tpu.vector_store %arg1[%c0_1, %c0_2], %2 {strides = array<i32>} : memref<2x30xf32, #tpu.memory_space<vmem>>, vector<2x30xf32>,
    return
  }
}

</mosaic_0001>

<bundles_post_ra>
// kernel: tpu_custom_call.1
= control target key start
LH: loop header
LB: loop body
LE: loop exit
PB: predicated region body
PF: predicated region fallthrough
CT: control target
= control target key end

     0   :  { %6 = vsyncpa [#allocation3], 0  ;;  %s132_s0 = inlined_call_operand.hbm [shape: f32[1,30], index: 0, kind: input, shape index: {}]   ;;  %s133_s1 = inlined_call_operand.hbm [shape: f32[2,30], index: 1, kind: output, shape index: {}]  }
   0x1   :  { %7 = vsyncpa [#allocation4], 0  ;;  %s96_s6 = smov [#allocation2]   ;;  %s48_s10 = scalar_lea.hbm %s132_s0, 16 }
   0x2   :  { %s14_s7 = sshll.u32 %s96_s6, 4  ;;  %p49_p0 = scmp.ne.s32.totalorder %s132_s0, %s48_s10  ;;  %s15_s7 = int_to_ptr.vmem [resolvable:$true] %s14_s7 }
   0x3   :  { %p52_p1 = scmp.lt.u32.totalorder %s48_s10, %s132_s0 }
   0x5   :  { %p54_p2 = pnand %p52_p1, %p49_p0 }
   0x7   :  { %57 = shalt.err (!%p54_p2)
}
   0x8   :  { %s58_s15 = scalar_lea.vmem %s15_s7, 16  ;;  %s62_s16 = scalar_lea.vmem %s15_s7, 32 }
   0x9   :  { %p59_p3 = scmp.ne.s32.totalorder %s15_s7, %s58_s15  ;;  %p63_p4 = scmp.lt.s32.totalorder %s15_s7, %s15_s7 }
   0xa   :  { %p64_p5 = scmp.lt.s32.totalorder %s62_s16, %s58_s15 }
   0xc   :  { %p65_p6 = por %p64_p5, %p63_p4 }
   0xe   :  { %p66_p7 = pnand %p65_p6, %p59_p3 }
  0x10   :  { %69 = shalt.err (!%p66_p7)
}
  0x11   :  { %17 = dma.hbm_to_vmem [thread:$0]  %s132_s0, 16, %s15_s7, [#allocation3]  }
  0x12   :  { %92 = dma.done.wait [#allocation3], 16  }
  0x13   :  { %93 = vsyncadd [#allocation3], 4294967280  ;;  %s97_s19 = smov [#allocation5]   ;;  %vm28_vm0 = vcmask 238592   ;;  %v45_v0 = vld [vmem:[#allocation2] ss:$0 sm:$0xff] }
  0x14   :  { %s36_s20 = sshll.u32 %s97_s19, 4  ;;  %29 = vst.msk [vmem:[#allocation5] sm:$0x3] %vm28_vm0, %v45_v0  ;;  %s37_s20 = int_to_ptr.vmem [resolvable:$true] %s36_s20 }
  0x15   :  { %s70_s21 = scalar_lea.vmem %s37_s20, 32  ;;  %p75_p9 = scmp.lt.s32.totalorder %s37_s20, %s37_s20 }
  0x16   :  { %p71_p8 = scmp.ne.s32.totalorder %s37_s20, %s70_s21  ;;  %p76_p10 = scmp.lt.s32.totalorder %s70_s21, %s70_s21 }
  0x18   :  { %p77_p11 = por %p76_p10, %p75_p9 }
  0x1a   :  { %p78_p12 = pnand %p77_p11, %p71_p8 }
  0x1c   :  { %81 = shalt.err (!%p78_p12)
}
  0x1d   :  { %s82_s24 = scalar_lea.hbm %s133_s1, 32 }
  0x1e   :  { %p83_p13 = scmp.ne.s32.totalorder %s133_s1, %s82_s24  ;;  %p86_p0 = scmp.lt.u32.totalorder %s82_s24, %s133_s1 }
  0x20   :  { %p88_p1 = pnand %p86_p0, %p83_p13 }
  0x22   :  { %91 = shalt.err (!%p88_p1)
}
  0x23   :  { %39 = dma.vmem_to_hbm [thread:$0]  %s37_s20, 32, %s133_s1, [#allocation4]  }
  0x24   :  { %94 = dma.done.wait [#allocation4], 32  }
  0x25   :  { %95 = vsyncadd [#allocation4], 4294967264 }
  0x26   :  { %43 = vsyncpa [#allocation3], 1 }
  0x27   :  { %44 = vsyncpa [#allocation4], 1 }

</bundles_post_ra>
